<compile_context>
chip_gen: v6e
topology: v6e:2x2x1
jax: 0.10.0
libtpu: 0.0.40
codegen_flags: <defaults>
</compile_context>

<pallas_src>
import functools

import jax
import jax.numpy as jnp
from jax import lax
from jax.experimental import pallas as pl
from jax.experimental.pallas import tpu as pltpu

EPS = 1e-5


def _row_shift(slab, H, *, up):
    """Shift a [N*H, L] row slab by one image row, entirely in vregs.

    up=False: result[r] = slab[r-1]  (conv tap dy=0); rows with h == 0     zeroed.
    up=True : result[r] = slab[r+1]  (conv tap dy=2); rows with h == H-1   zeroed.
    The mask also removes the cross-sample wrap introduced by the rotate.
    """
    NH, L = slab.shape
    h = lax.broadcasted_iota(jnp.int32, (NH, L), 0) % H
    if up:
        rolled = pltpu.roll(slab, shift=NH - 1, axis=0)   # == roll by -1
        keep = h != (H - 1)
    else:
        rolled = pltpu.roll(slab, shift=1, axis=0)
        keep = h != 0
    return jnp.where(keep, rolled, 0.0)


def _bn_train_lane(slab, gamma_lane, beta_lane, C, count):
    """Training-mode BatchNorm on a lane-dense slab [P, W*C] (channel = lane % C).

    Per-channel sums are folded with a log2(W)-step lane roll+add tree (XLU slot,
    no MXU).  Since W*C equals the slab's lane width, the fold leaves every lane
    holding its own channel's sum, so no broadcast step is needed.  Centered
    (two-pass) variance; biased normalization (PyTorch training forward). All f32.
    """
    L = slab.shape[-1]

    def fold(v):                       # [1, L] -> per-channel sum in every lane
        shift = C
        while shift < L:
            v = v + pltpu.roll(v, shift=shift, axis=1)
            shift *= 2
        return v

    inv_n = 1.0 / count
    mean = fold(jnp.sum(slab, axis=0, keepdims=True)) * inv_n
    centered = slab - mean
    var = fold(jnp.sum(centered * centered, axis=0, keepdims=True)) * inv_n
    scale = gamma_lane * lax.rsqrt(var + EPS)
    return centered * scale + beta_lane


def basic_block_kernel(x_ref, w02_ref, wf_ref, w2_ref, bn_ref, out_ref,
                       *, N, H, W, Cin, Cout):
    del Cin  # layout is implicit in the weight matrices
    NH = N * H
    Lout = W * Cout
    cnt = float(N * H * W)             # BN element count per channel
    bf16 = jnp.bfloat16

    x = x_ref[...]                                            # [NH, Lin] f32

    # conv1 dy=1 tap fused with the 1x1 shortcut: one [NH,Lin] @ [Lin,2*Lout] matmul.
    fused = jnp.dot(x.astype(bf16), wf_ref[...],
                    preferred_element_type=jnp.float32)       # [NH, 2*Lout]
    c1 = fused[:, :Lout]               # dy=1 contribution (lane-aligned slice)
    sc = fused[:, Lout:]               # 1x1 shortcut, pre-BN

    # conv1 dy=0 / dy=2 taps: rolled + masked slabs, one MXU matmul each.
    x_dn = _row_shift(x, H, up=False).astype(bf16)
    x_up = _row_shift(x, H, up=True).astype(bf16)
    c1 = c1 + jnp.dot(x_dn, w02_ref[0], preferred_element_type=jnp.float32)
    c1 = c1 + jnp.dot(x_up, w02_ref[1], preferred_element_type=jnp.float32)

    out1 = jnp.maximum(
        _bn_train_lane(c1, bn_ref[0:1, :], bn_ref[1:2, :], Cout, cnt), 0.0)

    # conv2: same 3-tap structure on the [NH, Lout] intermediate (stays in vregs).
    c2 = jnp.dot(out1.astype(bf16), w2_ref[1], preferred_element_type=jnp.float32)
    o_dn = _row_shift(out1, H, up=False).astype(bf16)
    o_up = _row_shift(out1, H, up=True).astype(bf16)
    c2 = c2 + jnp.dot(o_dn, w2_ref[0], preferred_element_type=jnp.float32)
    c2 = c2 + jnp.dot(o_up, w2_ref[2], preferred_element_type=jnp.float32)

    out2 = _bn_train_lane(c2, bn_ref[2:3, :], bn_ref[3:4, :], Cout, cnt)
    scb = _bn_train_lane(sc, bn_ref[4:5, :], bn_ref[5:6, :], Cout, cnt)

    # Residual add + relu; lane-dense [NH, W*Cout] store (full 128 lanes, no vst.msk).
    out_ref[...] = jnp.maximum(out2 + scb, 0.0)


# ------------------------- wrapper-side weight prep ---------------------------
def _width_toeplitz(w_hwio, W):
    """[3, 3, Ci, Co] conv weights -> [3, W*Ci, W*Co] width-Toeplitz matrices.

    T[dy, wi*Ci+ci, wo*Co+co] = w[dy, wi-wo+1, ci, co] if |wi-wo| <= 1 else 0.
    (dy-shifted input row slab) @ T[dy], summed over dy, equals the 3x3 conv;
    width zero-padding is absorbed by the validity mask.
    """
    kh, kw, Ci, Co = w_hwio.shape
    dy = jnp.arange(kh).reshape(kh, 1, 1, 1, 1)
    wi = jnp.arange(W).reshape(1, W, 1, 1, 1)
    ci = jnp.arange(Ci).reshape(1, 1, Ci, 1, 1)
    wo = jnp.arange(W).reshape(1, 1, 1, W, 1)
    co = jnp.arange(Co).reshape(1, 1, 1, 1, Co)
    dx = wi - wo + 1
    valid = (dx >= 0) & (dx < kw)
    vals = w_hwio[dy, jnp.clip(dx, 0, kw - 1), ci, co] * valid.astype(w_hwio.dtype)
    return vals.reshape(kh, W * Ci, W * Co)


def _block_diag_1x1(ws, W):
    """[Ci, Co] 1x1 conv weights -> [W*Ci, W*Co] block-diagonal matrix."""
    Ci, Co = ws.shape
    eye = jnp.eye(W, dtype=ws.dtype)
    return (eye[:, None, :, None] * ws[None, :, None, :]).reshape(W * Ci, W * Co)


def basic_block(x_nchw, params):
    """x_nchw: [N, Cin, H, W] float32 (PyTorch layout). Returns [N, Cout, H, W].

    Implements the stride=1, in_planes != planes instance (1x1-conv shortcut).
    """
    # TODO(synk): stride=2 variant (strided conv1 + strided 1x1 shortcut) and the
    # identity-shortcut case (in_planes == planes) are not implemented here.
    w1, g1, b1, w2, g2, b2, ws, gs, bs = params
    N, Cin, H, W = x_nchw.shape
    Cout = w1.shape[-1]
    assert W & (W - 1) == 0, "lane fold tree requires power-of-two width"
    Lin, Lout = W * Cin, W * Cout

    # NCHW -> lane-dense row slab [N*H, W*Cin] (channel fastest inside a lane group).
    x_slab = jnp.transpose(x_nchw, (0, 2, 3, 1)).astype(jnp.float32).reshape(N * H, Lin)

    t1 = _width_toeplitz(w1.astype(jnp.float32), W)           # [3, Lin,  Lout]
    t2 = _width_toeplitz(w2.astype(jnp.float32), W)           # [3, Lout, Lout]
    ts = _block_diag_1x1(ws.astype(jnp.float32), W)           # [Lin, Lout]

    # bf16 weight storage (the MXU rounds operands to bf16 anyway; halves DMA bytes).
    w02 = jnp.stack([t1[0], t1[2]]).astype(jnp.bfloat16)            # [2, Lin, Lout]
    wf = jnp.concatenate([t1[1], ts], axis=1).astype(jnp.bfloat16)  # [Lin, 2*Lout]
    w2m = t2.astype(jnp.bfloat16)                                   # [3, Lout, Lout]

    # BN params packed into one (8, W*Cout) tile, pre-tiled to lane layout so the
    # kernel needs no per-channel broadcast. Rows: g1, b1, g2, b2, gs, bs, pad, pad.
    zero = jnp.zeros((Cout,), jnp.float32)
    bn_pack = jnp.stack([jnp.tile(p.astype(jnp.float32), W)
                         for p in (g1, b1, g2, b2, gs, bs, zero, zero)])  # [8, Lout]

    kernel = functools.partial(basic_block_kernel, N=N, H=H, W=W, Cin=Cin, Cout=Cout)
    vmem = pl.BlockSpec(memory_space=pltpu.MemorySpace.VMEM)

    # Grid-less: the whole block (5 operands, ~170 KiB) sits comfortably in VMEM.
    # TODO(synk): for real ResNet sizes, add a "parallel" grid over N/H row-tiles
    # (uses both v7x TensorCores) with per-tile BN partial sums finalized on a
    # trailing "arbitrary" axis, weights kept resident via a constant index_map,
    # and row tiles sized for v7x's 64 MiB VMEM with matmul M >= 256 on v6e/v7x.
    out_slab = pl.pallas_call(
        kernel,
        out_shape=jax.ShapeDtypeStruct((N * H, Lout), jnp.float32),
        in_specs=[vmem] * 5,
        out_specs=vmem,
    )(x_slab, w02, wf, w2m, bn_pack)

    return jnp.transpose(out_slab.reshape(N, H, W, Cout), (0, 3, 1, 2))


# ----------------------------- pure-JAX reference -----------------------------
def basic_block_ref(x_nchw, params):
    w1, g1, b1, w2, g2, b2, ws, gs, bs = params
    Cin, Cout = ws.shape
    x = jnp.transpose(x_nchw, (0, 2, 3, 1)).astype(jnp.float32)

    def conv(x, w, pad):
        return lax.conv_general_dilated(
            x, w, (1, 1), [(pad, pad), (pad, pad)],
            dimension_numbers=("NHWC", "HWIO", "NHWC"),
            precision=lax.Precision.HIGHEST)

    def bn(x, g, b):
        m = jnp.mean(x, axis=(0, 1, 2))
        v = jnp.mean((x - m) ** 2, axis=(0, 1, 2))
        return (x - m) * lax.rsqrt(v + EPS) * g + b

    out = jax.nn.relu(bn(conv(x, w1, 1), g1, b1))
    out = bn(conv(out, w2, 1), g2, b2)
    sc = bn(conv(x, ws.reshape(1, 1, Cin, Cout), 0), gs, bs)
    out = jax.nn.relu(out + sc)
    return jnp.transpose(out, (0, 3, 1, 2))


if __name__ == "__main__":
    N, Cin, Cout, H, W = 2, 4, 8, 16, 16      # in_planes=4, planes=8, stride=1

    key = jax.random.PRNGKey(0)
    ks = jax.random.split(key, 10)
    x = jax.random.normal(ks[0], (N, Cin, H, W), jnp.float32)

    # Deterministic synthetic parameters (shapes from the module __init__).
    w1 = jax.random.normal(ks[1], (3, 3, Cin, Cout), jnp.float32) / jnp.sqrt(9.0 * Cin)
    w2 = jax.random.normal(ks[2], (3, 3, Cout, Cout), jnp.float32) / jnp.sqrt(9.0 * Cout)
    ws = jax.random.normal(ks[3], (Cin, Cout), jnp.float32) / jnp.sqrt(1.0 * Cin)
    g1 = 1.0 + 0.1 * jax.random.normal(ks[4], (Cout,), jnp.float32)
    b1 = 0.1 * jax.random.normal(ks[5], (Cout,), jnp.float32)
    g2 = 1.0 + 0.1 * jax.random.normal(ks[6], (Cout,), jnp.float32)
    b2 = 0.1 * jax.random.normal(ks[7], (Cout,), jnp.float32)
    gs = 1.0 + 0.1 * jax.random.normal(ks[8], (Cout,), jnp.float32)
    bs = 0.1 * jax.random.normal(ks[9], (Cout,), jnp.float32)
    params = (w1, g1, b1, w2, g2, b2, ws, gs, bs)

    out = jax.block_until_ready(basic_block(x, params))
    ref = jax.block_until_ready(basic_block_ref(x, params))

    assert out.shape == (N, Cout, H, W), out.shape
    # Conv matmuls use single-pass bf16 operands on the MXU (f32 accumulate); BN
    # statistics are exact f32, so ~3e-2 absorbs the bf16 rounding across the two
    # chained convs vs. the HIGHEST-precision reference.
    max_err = float(jnp.max(jnp.abs(out - ref)))
    assert bool(jnp.allclose(out, ref, atol=3e-2, rtol=3e-2)), f"max abs err {max_err}"
    print("KERNEL_OK")
</pallas_src>

<mosaic_0001>
module attributes {stable_mosaic.version = 11 : i64} {
  func.func @basic_block_kernel(%arg0: memref<32x64xf32, #tpu.memory_space<vmem>>, %arg1: memref<2x64x128xbf16, #tpu.memory_space<vmem>>, %arg2: memref<64x256xbf16, #tpu.memory_space<vmem>>, %arg3: memref<3x128x128xbf16, #tpu.memory_space<vmem>>, %arg4: memref<8x128xf32, #tpu.memory_space<vmem>>, %arg5: memref<32x128xf32, #tpu.memory_space<vmem>>) attributes {dimension_semantics = [], scalar_prefetch = 0 : i64, scratch_operands = 0 : i64, tpu.core_type = #tpu.core_type<tc>} {
    %c0 = arith.constant 0 : index
    %c0_0 = arith.constant 0 : index
    %0 = vector.load %arg0[%c0, %c0_0] : memref<32x64xf32, #tpu.memory_space<vmem>>, vector<32x64xf32>
    %1 = arith.truncf %0 : vector<32x64xf32> to vector<32x64xbf16>
    %c0_1 = arith.constant 0 : index
    %c0_2 = arith.constant 0 : index
    %2 = vector.load %arg2[%c0_1, %c0_2] : memref<64x256xbf16, #tpu.memory_space<vmem>>, vector<64x256xbf16>
    %cst = arith.constant dense<0.000000e+00> : vector<32x256xf32>
    %3 = tpu.matmul %1, %2, %cst {dimension_numbers = #tpu.dot_dimension_numbers<[1], [0], [0], [1], [0, 0, 1, 1], [], []>} : vector<32x64xbf16>, vector<64x256xbf16>, vector<32x256xf32> -> vector<32x256xf32>
    %4 = vector.extract_strided_slice %3 {offsets = [0, 0], sizes = [32, 128], strides = [1, 1]} : vector<32x256xf32> to vector<32x128xf32>
    %5 = vector.extract_strided_slice %3 {offsets = [0, 128], sizes = [32, 128], strides = [1, 1]} : vector<32x256xf32> to vector<32x128xf32>
    %6 = tpu.iota {dimensions = array<i32: 0>} : vector<32x64xi32>
    %c16_i32 = arith.constant 16 : i32
    %c0_i32 = arith.constant 0 : i32
    %7 = arith.cmpi eq, %c16_i32, %c0_i32 : i32
    %c1_i32 = arith.constant 1 : i32
    %8 = arith.select %7, %c1_i32, %c16_i32 : i32
    %9 = vector.broadcast %8 : i32 to vector<32x64xi32>
    %10 = arith.remsi %6, %9 : vector<32x64xi32>
    %c0_i32_3 = arith.constant 0 : i32
    %11 = vector.broadcast %c0_i32_3 : i32 to vector<32x64xi32>
    %12 = arith.cmpi ne, %10, %11 : vector<32x64xi32>
    %c0_i32_4 = arith.constant 0 : i32
    %13 = vector.broadcast %c0_i32_4 : i32 to vector<32x64xi32>
    %14 = arith.cmpi slt, %10, %13 : vector<32x64xi32>
    %c0_i32_5 = arith.constant 0 : i32
    %15 = arith.cmpi slt, %8, %c0_i32_5 : i32
    %16 = vector.broadcast %15 : i1 to vector<32x64xi1>
    %17 = vector.broadcast %16 : vector<32x64xi1> to vector<32x64xi1>
    %18 = arith.xori %14, %17 : vector<32x64xi1>
    %19 = arith.andi %18, %12 : vector<32x64xi1>
    %20 = vector.broadcast %8 : i32 to vector<32x64xi32>
    %21 = arith.addi %10, %20 : vector<32x64xi32>
    %22 = arith.select %19, %21, %10 : vector<32x64xi1>, vector<32x64xi32>
    %c1_i32_6 = arith.constant 1 : i32
    %23 = tpu.dynamic_rotate %0 by %c1_i32_6 dim 0 : vector<32x64xf32>, i32 -> vector<32x64xf32>
    %c0_i32_7 = arith.constant 0 : i32
    %24 = vector.broadcast %c0_i32_7 : i32 to vector<32x64xi32>
    %25 = arith.cmpi ne, %22, %24 : vector<32x64xi32>
    %cst_8 = arith.constant 0.000000e+00 : f32
    %26 = vector.broadcast %cst_8 : f32 to vector<32x64xf32>
    %27 = arith.select %25, %23, %26 : vector<32x64xi1>, vector<32x64xf32>
    %28 = arith.truncf %27 : vector<32x64xf32> to vector<32x64xbf16>
    %29 = tpu.iota {dimensions = array<i32: 0>} : vector<32x64xi32>
    %c16_i32_9 = arith.constant 16 : i32
    %c0_i32_10 = arith.constant 0 : i32
    %30 = arith.cmpi eq, %c16_i32_9, %c0_i32_10 : i32
    %c1_i32_11 = arith.constant 1 : i32
    %31 = arith.select %30, %c1_i32_11, %c16_i32_9 : i32
    %32 = vector.broadcast %31 : i32 to vector<32x64xi32>
    %33 = arith.remsi %29, %32 : vector<32x64xi32>
    %c0_i32_12 = arith.constant 0 : i32
    %34 = vector.broadcast %c0_i32_12 : i32 to vector<32x64xi32>
    %35 = arith.cmpi ne, %33, %34 : vector<32x64xi32>
    %c0_i32_13 = arith.constant 0 : i32
    %36 = vector.broadcast %c0_i32_13 : i32 to vector<32x64xi32>
    %37 = arith.cmpi slt, %33, %36 : vector<32x64xi32>
    %c0_i32_14 = arith.constant 0 : i32
    %38 = arith.cmpi slt, %31, %c0_i32_14 : i32
    %39 = vector.broadcast %38 : i1 to vector<32x64xi1>
    %40 = vector.broadcast %39 : vector<32x64xi1> to vector<32x64xi1>
    %41 = arith.xori %37, %40 : vector<32x64xi1>
    %42 = arith.andi %41, %35 : vector<32x64xi1>
    %43 = vector.broadcast %31 : i32 to vector<32x64xi32>
    %44 = arith.addi %33, %43 : vector<32x64xi32>
    %45 = arith.select %42, %44, %33 : vector<32x64xi1>, vector<32x64xi32>
    %c31_i32 = arith.constant 31 : i32
    %46 = tpu.dynamic_rotate %0 by %c31_i32 dim 0 : vector<32x64xf32>, i32 -> vector<32x64xf32>
    %c15_i32 = arith.constant 15 : i32
    %47 = vector.broadcast %c15_i32 : i32 to vector<32x64xi32>
    %48 = arith.cmpi ne, %45, %47 : vector<32x64xi32>
    %cst_15 = arith.constant 0.000000e+00 : f32
    %49 = vector.broadcast %cst_15 : f32 to vector<32x64xf32>
    %50 = arith.select %48, %46, %49 : vector<32x64xi1>, vector<32x64xf32>
    %51 = arith.truncf %50 : vector<32x64xf32> to vector<32x64xbf16>
    %c0_16 = arith.constant 0 : index
    %c0_17 = arith.constant 0 : index
    %c0_18 = arith.constant 0 : index
    %52 = vector.load %arg1[%c0_16, %c0_17, %c0_18] : memref<2x64x128xbf16, #tpu.memory_space<vmem>>, vector<1x64x128xbf16>
    %53 = vector.shape_cast %52 : vector<1x64x128xbf16> to vector<64x128xbf16>
    %cst_19 = arith.constant dense<0.000000e+00> : vector<32x128xf32>
    %54 = tpu.matmul %28, %53, %cst_19 {dimension_numbers = #tpu.dot_dimension_numbers<[1], [0], [0], [1], [0, 0, 1, 1], [], []>} : vector<32x64xbf16>, vector<64x128xbf16>, vector<32x128xf32> -> vector<32x128xf32>
    %55 = arith.addf %4, %54 : vector<32x128xf32>
    %c1 = arith.constant 1 : index
    %c0_20 = arith.constant 0 : index
    %c0_21 = arith.constant 0 : index
    %56 = vector.load %arg1[%c1, %c0_20, %c0_21] : memref<2x64x128xbf16, #tpu.memory_space<vmem>>, vector<1x64x128xbf16>
    %57 = vector.shape_cast %56 : vector<1x64x128xbf16> to vector<64x128xbf16>
    %cst_22 = arith.constant dense<0.000000e+00> : vector<32x128xf32>
    %58 = tpu.matmul %51, %57, %cst_22 {dimension_numbers = #tpu.dot_dimension_numbers<[1], [0], [0], [1], [0, 0, 1, 1], [], []>} : vector<32x64xbf16>, vector<64x128xbf16>, vector<32x128xf32> -> vector<32x128xf32>
    %59 = arith.addf %55, %58 : vector<32x128xf32>
    %c0_23 = arith.constant 0 : index
    %c0_24 = arith.constant 0 : index
    %60 = vector.load %arg4[%c0_23, %c0_24] : memref<8x128xf32, #tpu.memory_space<vmem>>, vector<1x128xf32>
    %c1_25 = arith.constant 1 : index
    %c0_26 = arith.constant 0 : index
    %61 = vector.load %arg4[%c1_25, %c0_26] : memref<8x128xf32, #tpu.memory_space<vmem>>, vector<1x128xf32>
    %cst_27 = arith.constant dense<0.000000e+00> : vector<128xf32>
    %62 = vector.multi_reduction <add>, %59, %cst_27 [0] : vector<32x128xf32> to vector<128xf32>
    %63 = vector.shape_cast %62 : vector<128xf32> to vector<1x128xf32>
    %c8_i32 = arith.constant 8 : i32
    %64 = tpu.dynamic_rotate %63 by %c8_i32 dim 1 : vector<1x128xf32>, i32 -> vector<1x128xf32>
    %65 = arith.addf %63, %64 : vector<1x128xf32>
    %c16_i32_28 = arith.constant 16 : i32
    %66 = tpu.dynamic_rotate %65 by %c16_i32_28 dim 1 : vector<1x128xf32>, i32 -> vector<1x128xf32>
    %67 = arith.addf %65, %66 : vector<1x128xf32>
    %c32_i32 = arith.constant 32 : i32
    %68 = tpu.dynamic_rotate %67 by %c32_i32 dim 1 : vector<1x128xf32>, i32 -> vector<1x128xf32>
    %69 = arith.addf %67, %68 : vector<1x128xf32>
    %c64_i32 = arith.constant 64 : i32
    %70 = tpu.dynamic_rotate %69 by %c64_i32 dim 1 : vector<1x128xf32>, i32 -> vector<1x128xf32>
    %71 = arith.addf %69, %70 : vector<1x128xf32>
    %cst_29 = arith.constant 0.001953125 : f32
    %72 = vector.broadcast %cst_29 : f32 to vector<1x128xf32>
    %73 = arith.mulf %71, %72 : vector<1x128xf32>
    %74 = vector.broadcast %73 : vector<1x128xf32> to vector<32x128xf32>
    %75 = arith.subf %59, %74 : vector<32x128xf32>
    %76 = arith.mulf %75, %75 : vector<32x128xf32>
    %cst_30 = arith.constant dense<0.000000e+00> : vector<128xf32>
    %77 = vector.multi_reduction <add>, %76, %cst_30 [0] : vector<32x128xf32> to vector<128xf32>
    %78 = vector.shape_cast %77 : vector<128xf32> to vector<1x128xf32>
    %c8_i32_31 = arith.constant 8 : i32
    %79 = tpu.dynamic_rotate %78 by %c8_i32_31 dim 1 : vector<1x128xf32>, i32 -> vector<1x128xf32>
    %80 = arith.addf %78, %79 : vector<1x128xf32>
    %c16_i32_32 = arith.constant 16 : i32
    %81 = tpu.dynamic_rotate %80 by %c16_i32_32 dim 1 : vector<1x128xf32>, i32 -> vector<1x128xf32>
    %82 = arith.addf %80, %81 : vector<1x128xf32>
    %c32_i32_33 = arith.constant 32 : i32
    %83 = tpu.dynamic_rotate %82 by %c32_i32_33 dim 1 : vector<1x128xf32>, i32 -> vector<1x128xf32>
    %84 = arith.addf %82, %83 : vector<1x128xf32>
    %c64_i32_34 = arith.constant 64 : i32
    %85 = tpu.dynamic_rotate %84 by %c64_i32_34 dim 1 : vector<1x128xf32>, i32 -> vector<1x128xf32>
    %86 = arith.addf %84, %85 : vector<1x128xf32>
    %cst_35 = arith.constant 0.001953125 : f32
    %87 = vector.broadcast %cst_35 : f32 to vector<1x128xf32>
    %88 = arith.mulf %86, %87 : vector<1x128xf32>
    %cst_36 = arith.constant 9.99999974E-6 : f32
    %89 = vector.broadcast %cst_36 : f32 to vector<1x128xf32>
    %90 = arith.addf %88, %89 : vector<1x128xf32>
    %91 = math.rsqrt %90 : vector<1x128xf32>
    %92 = arith.mulf %60, %91 : vector<1x128xf32>
    %93 = vector.broadcast %92 : vector<1x128xf32> to vector<32x128xf32>
    %94 = arith.mulf %75, %93 : vector<32x128xf32>
    %95 = vector.broadcast %61 : vector<1x128xf32> to vector<32x128xf32>
    %96 = arith.addf %94, %95 : vector<32x128xf32>
    %cst_37 = arith.constant 0.000000e+00 : f32
    %97 = vector.broadcast %cst_37 : f32 to vector<32x128xf32>
    %98 = arith.maximumf %96, %97 : vector<32x128xf32>
    %99 = arith.truncf %98 : vector<32x128xf32> to vector<32x128xbf16>
    %c1_38 = arith.constant 1 : index
    %c0_39 = arith.constant 0 : index
    %c0_40 = arith.constant 0 : index
    %100 = vector.load %arg3[%c1_38, %c0_39, %c0_40] : memref<3x128x128xbf16, #tpu.memory_space<vmem>>, vector<1x128x128xbf16>
    %101 = vector.shape_cast %100 : vector<1x128x128xbf16> to vector<128x128xbf16>
    %cst_41 = arith.constant dense<0.000000e+00> : vector<32x128xf32>
    %102 = tpu.matmul %99, %101, %cst_41 {dimension_numbers = #tpu.dot_dimension_numbers<[1], [0], [0], [1], [0, 0, 1, 1], [], []>} : vector<32x128xbf16>, vector<128x128xbf16>, vector<32x128xf32> -> vector<32x128xf32>
    %103 = tpu.iota {dimensions = array<i32: 0>} : vector<32x128xi32>
    %c16_i32_42 = arith.constant 16 : i32
    %c0_i32_43 = arith.constant 0 : i32
    %104 = arith.cmpi eq, %c16_i32_42, %c0_i32_43 : i32
    %c1_i32_44 = arith.constant 1 : i32
    %105 = arith.select %104, %c1_i32_44, %c16_i32_42 : i32
    %106 = vector.broadcast %105 : i32 to vector<32x128xi32>
    %107 = arith.remsi %103, %106 : vector<32x128xi32>
    %c0_i32_45 = arith.constant 0 : i32
    %108 = vector.broadcast %c0_i32_45 : i32 to vector<32x128xi32>
    %109 = arith.cmpi ne, %107, %108 : vector<32x128xi32>
    %c0_i32_46 = arith.constant 0 : i32
    %110 = vector.broadcast %c0_i32_46 : i32 to vector<32x128xi32>
    %111 = arith.cmpi slt, %107, %110 : vector<32x128xi32>
    %c0_i32_47 = arith.constant 0 : i32
    %112 = arith.cmpi slt, %105, %c0_i32_47 : i32
    %113 = vector.broadcast %112 : i1 to vector<32x128xi1>
    %114 = vector.broadcast %113 : vector<32x128xi1> to vector<32x128xi1>
    %115 = arith.xori %111, %114 : vector<32x128xi1>
    %116 = arith.andi %115, %109 : vector<32x128xi1>
    %117 = vector.broadcast %105 : i32 to vector<32x128xi32>
    %118 = arith.addi %107, %117 : vector<32x128xi32>
    %119 = arith.select %116, %118, %107 : vector<32x128xi1>, vector<32x128xi32>
    %c1_i32_48 = arith.constant 1 : i32
    %120 = tpu.dynamic_rotate %98 by %c1_i32_48 dim 0 : vector<32x128xf32>, i32 -> vector<32x128xf32>
    %c0_i32_49 = arith.constant 0 : i32
    %121 = vector.broadcast %c0_i32_49 : i32 to vector<32x128xi32>
    %122 = arith.cmpi ne, %119, %121 : vector<32x128xi32>
    %cst_50 = arith.constant 0.000000e+00 : f32
    %123 = vector.broadcast %cst_50 : f32 to vector<32x128xf32>
    %124 = arith.select %122, %120, %123 : vector<32x128xi1>, vector<32x128xf32>
    %125 = arith.truncf %124 : vector<32x128xf32> to vector<32x128xbf16>
    %126 = tpu.iota {dimensions = array<i32: 0>} : vector<32x128xi32>
    %c16_i32_51 = arith.constant 16 : i32
    %c0_i32_52 = arith.constant 0 : i32
    %127 = arith.cmpi eq, %c16_i32_51, %c0_i32_52 : i32
    %c1_i32_53 = arith.constant 1 : i32
    %128 = arith.select %127, %c1_i32_53, %c16_i32_51 : i32
    %129 = vector.broadcast %128 : i32 to vector<32x128xi32>
    %130 = arith.remsi %126, %129 : vector<32x128xi32>
    %c0_i32_54 = arith.constant 0 : i32
    %131 = vector.broadcast %c0_i32_54 : i32 to vector<32x128xi32>
    %132 = arith.cmpi ne, %130, %131 : vector<32x128xi32>
    %c0_i32_55 = arith.constant 0 : i32
    %133 = vector.broadcast %c0_i32_55 : i32 to vector<32x128xi32>
    %134 = arith.cmpi slt, %130, %133 : vector<32x128xi32>
    %c0_i32_56 = arith.constant 0 : i32
    %135 = arith.cmpi slt, %128, %c0_i32_56 : i32
    %136 = vector.broadcast %135 : i1 to vector<32x128xi1>
    %137 = vector.broadcast %136 : vector<32x128xi1> to vector<32x128xi1>
    %138 = arith.xori %134, %137 : vector<32x128xi1>
    %139 = arith.andi %138, %132 : vector<32x128xi1>
    %140 = vector.broadcast %128 : i32 to vector<32x128xi32>
    %141 = arith.addi %130, %140 : vector<32x128xi32>
    %142 = arith.select %139, %141, %130 : vector<32x128xi1>, vector<32x128xi32>
    %c31_i32_57 = arith.constant 31 : i32
    %143 = tpu.dynamic_rotate %98 by %c31_i32_57 dim 0 : vector<32x128xf32>, i32 -> vector<32x128xf32>
    %c15_i32_58 = arith.constant 15 : i32
    %144 = vector.broadcast %c15_i32_58 : i32 to vector<32x128xi32>
    %145 = arith.cmpi ne, %142, %144 : vector<32x128xi32>
    %cst_59 = arith.constant 0.000000e+00 : f32
    %146 = vector.broadcast %cst_59 : f32 to vector<32x128xf32>
    %147 = arith.select %145, %143, %146 : vector<32x128xi1>, vector<32x128xf32>
    %148 = arith.truncf %147 : vector<32x128xf32> to vector<32x128xbf16>
    %c0_60 = arith.constant 0 : index
    %c0_61 = arith.constant 0 : index
    %c0_62 = arith.constant 0 : index
    %149 = vector.load %arg3[%c0_60, %c0_61, %c0_62] : memref<3x128x128xbf16, #tpu.memory_space<vmem>>, vector<1x128x128xbf16>
    %150 = vector.shape_cast %149 : vector<1x128x128xbf16> to vector<128x128xbf16>
    %cst_63 = arith.constant dense<0.000000e+00> : vector<32x128xf32>
    %151 = tpu.matmul %125, %150, %cst_63 {dimension_numbers = #tpu.dot_dimension_numbers<[1], [0], [0], [1], [0, 0, 1, 1], [], []>} : vector<32x128xbf16>, vector<128x128xbf16>, vector<32x128xf32> -> vector<32x128xf32>
    %152 = arith.addf %102, %151 : vector<32x128xf32>
    %c2 = arith.constant 2 : index
    %c0_64 = arith.constant 0 : index
    %c0_65 = arith.constant 0 : index
    %153 = vector.load %arg3[%c2, %c0_64, %c0_65] : memref<3x128x128xbf16, #tpu.memory_space<vmem>>, vector<1x128x128xbf16>
    %154 = vector.shape_cast %153 : vector<1x128x128xbf16> to vector<128x128xbf16>
    %cst_66 = arith.constant dense<0.000000e+00> : vector<32x128xf32>
    %155 = tpu.matmul %148, %154, %cst_66 {dimension_numbers = #tpu.dot_dimension_numbers<[1], [0], [0], [1], [0, 0, 1, 1], [], []>} : vector<32x128xbf16>, vector<128x128xbf16>, vector<32x128xf32> -> vector<32x128xf32>
    %156 = arith.addf %152, %155 : vector<32x128xf32>
    %c2_67 = arith.constant 2 : index
    %c0_68 = arith.constant 0 : index
    %157 = vector.load %arg4[%c2_67, %c0_68] : memref<8x128xf32, #tpu.memory_space<vmem>>, vector<1x128xf32>
    %c3 = arith.constant 3 : index
    %c0_69 = arith.constant 0 : index
    %158 = vector.load %arg4[%c3, %c0_69] : memref<8x128xf32, #tpu.memory_space<vmem>>, vector<1x128xf32>
    %cst_70 = arith.constant dense<0.000000e+00> : vector<128xf32>
    %159 = vector.multi_reduction <add>, %156, %cst_70 [0] : vector<32x128xf32> to vector<128xf32>
    %160 = vector.shape_cast %159 : vector<128xf32> to vector<1x128xf32>
    %c8_i32_71 = arith.constant 8 : i32
    %161 = tpu.dynamic_rotate %160 by %c8_i32_71 dim 1 : vector<1x128xf32>, i32 -> vector<1x128xf32>
    %162 = arith.addf %160, %161 : vector<1x128xf32>
    %c16_i32_72 = arith.constant 16 : i32
    %163 = tpu.dynamic_rotate %162 by %c16_i32_72 dim 1 : vector<1x128xf32>, i32 -> vector<1x128xf32>
    %164 = arith.addf %162, %163 : vector<1x128xf32>
    %c32_i32_73 = arith.constant 32 : i32
    %165 = tpu.dynamic_rotate %164 by %c32_i32_73 dim 1 : vector<1x128xf32>, i32 -> vector<1x128xf32>
    %166 = arith.addf %164, %165 : vector<1x128xf32>
    %c64_i32_74 = arith.constant 64 : i32
    %167 = tpu.dynamic_rotate %166 by %c64_i32_74 dim 1 : vector<1x128xf32>, i32 -> vector<1x128xf32>
    %168 = arith.addf %166, %167 : vector<1x128xf32>
    %cst_75 = arith.constant 0.001953125 : f32
    %169 = vector.broadcast %cst_75 : f32 to vector<1x128xf32>
    %170 = arith.mulf %168, %169 : vector<1x128xf32>
    %171 = vector.broadcast %170 : vector<1x128xf32> to vector<32x128xf32>
    %172 = arith.subf %156, %171 : vector<32x128xf32>
    %173 = arith.mulf %172, %172 : vector<32x128xf32>
    %cst_76 = arith.constant dense<0.000000e+00> : vector<128xf32>
    %174 = vector.multi_reduction <add>, %173, %cst_76 [0] : vector<32x128xf32> to vector<128xf32>
    %175 = vector.shape_cast %174 : vector<128xf32> to vector<1x128xf32>
    %c8_i32_77 = arith.constant 8 : i32
    %176 = tpu.dynamic_rotate %175 by %c8_i32_77 dim 1 : vector<1x128xf32>, i32 -> vector<1x128xf32>
    %177 = arith.addf %175, %176 : vector<1x128xf32>
    %c16_i32_78 = arith.constant 16 : i32
    %178 = tpu.dynamic_rotate %177 by %c16_i32_78 dim 1 : vector<1x128xf32>, i32 -> vector<1x128xf32>
    %179 = arith.addf %177, %178 : vector<1x128xf32>
    %c32_i32_79 = arith.constant 32 : i32
    %180 = tpu.dynamic_rotate %179 by %c32_i32_79 dim 1 : vector<1x128xf32>, i32 -> vector<1x128xf32>
    %181 = arith.addf %179, %180 : vector<1x128xf32>
    %c64_i32_80 = arith.constant 64 : i32
    %182 = tpu.dynamic_rotate %181 by %c64_i32_80 dim 1 : vector<1x128xf32>, i32 -> vector<1x128xf32>
    %183 = arith.addf %181, %182 : vector<1x128xf32>
    %cst_81 = arith.constant 0.001953125 : f32
    %184 = vector.broadcast %cst_81 : f32 to vector<1x128xf32>
    %185 = arith.mulf %183, %184 : vector<1x128xf32>
    %cst_82 = arith.constant 9.99999974E-6 : f32
    %186 = vector.broadcast %cst_82 : f32 to vector<1x128xf32>
    %187 = arith.addf %185, %186 : vector<1x128xf32>
    %188 = math.rsqrt %187 : vector<1x128xf32>
    %189 = arith.mulf %157, %188 : vector<1x128xf32>
    %190 = vector.broadcast %189 : vector<1x128xf32> to vector<32x128xf32>
    %191 = arith.mulf %172, %190 : vector<32x128xf32>
    %192 = vector.broadcast %158 : vector<1x128xf32> to vector<32x128xf32>
    %193 = arith.addf %191, %192 : vector<32x128xf32>
    %c4 = arith.constant 4 : index
    %c0_83 = arith.constant 0 : index
    %194 = vector.load %arg4[%c4, %c0_83] : memref<8x128xf32, #tpu.memory_space<vmem>>, vector<1x128xf32>
    %c5 = arith.constant 5 : index
    %c0_84 = arith.constant 0 : index
    %195 = vector.load %arg4[%c5, %c0_84] : memref<8x128xf32, #tpu.memory_space<vmem>>, vector<1x128xf32>
    %cst_85 = arith.constant dense<0.000000e+00> : vector<128xf32>
    %196 = vector.multi_reduction <add>, %5, %cst_85 [0] : vector<32x128xf32> to vector<128xf32>
    %197 = vector.shape_cast %196 : vector<128xf32> to vector<1x128xf32>
    %c8_i32_86 = arith.constant 8 : i32
    %198 = tpu.dynamic_rotate %197 by %c8_i32_86 dim 1 : vector<1x128xf32>, i32 -> vector<1x128xf32>
    %199 = arith.addf %197, %198 : vector<1x128xf32>
    %c16_i32_87 = arith.constant 16 : i32
    %200 = tpu.dynamic_rotate %199 by %c16_i32_87 dim 1 : vector<1x128xf32>, i32 -> vector<1x128xf32>
    %201 = arith.addf %199, %200 : vector<1x128xf32>
    %c32_i32_88 = arith.constant 32 : i32
    %202 = tpu.dynamic_rotate %201 by %c32_i32_88 dim 1 : vector<1x128xf32>, i32 -> vector<1x128xf32>
    %203 = arith.addf %201, %202 : vector<1x128xf32>
    %c64_i32_89 = arith.constant 64 : i32
    %204 = tpu.dynamic_rotate %203 by %c64_i32_89 dim 1 : vector<1x128xf32>, i32 -> vector<1x128xf32>
    %205 = arith.addf %203, %204 : vector<1x128xf32>
    %cst_90 = arith.constant 0.001953125 : f32
    %206 = vector.broadcast %cst_90 : f32 to vector<1x128xf32>
    %207 = arith.mulf %205, %206 : vector<1x128xf32>
    %208 = vector.broadcast %207 : vector<1x128xf32> to vector<32x128xf32>
    %209 = arith.subf %5, %208 : vector<32x128xf32>
    %210 = arith.mulf %209, %209 : vector<32x128xf32>
    %cst_91 = arith.constant dense<0.000000e+00> : vector<128xf32>
    %211 = vector.multi_reduction <add>, %210, %cst_91 [0] : vector<32x128xf32> to vector<128xf32>
    %212 = vector.shape_cast %211 : vector<128xf32> to vector<1x128xf32>
    %c8_i32_92 = arith.constant 8 : i32
    %213 = tpu.dynamic_rotate %212 by %c8_i32_92 dim 1 : vector<1x128xf32>, i32 -> vector<1x128xf32>
    %214 = arith.addf %212, %213 : vector<1x128xf32>
    %c16_i32_93 = arith.constant 16 : i32
    %215 = tpu.dynamic_rotate %214 by %c16_i32_93 dim 1 : vector<1x128xf32>, i32 -> vector<1x128xf32>
    %216 = arith.addf %214, %215 : vector<1x128xf32>
    %c32_i32_94 = arith.constant 32 : i32
    %217 = tpu.dynamic_rotate %216 by %c32_i32_94 dim 1 : vector<1x128xf32>, i32 -> vector<1x128xf32>
    %218 = arith.addf %216, %217 : vector<1x128xf32>
    %c64_i32_95 = arith.constant 64 : i32
    %219 = tpu.dynamic_rotate %218 by %c64_i32_95 dim 1 : vector<1x128xf32>, i32 -> vector<1x128xf32>
    %220 = arith.addf %218, %219 : vector<1x128xf32>
    %cst_96 = arith.constant 0.001953125 : f32
    %221 = vector.broadcast %cst_96 : f32 to vector<1x128xf32>
    %222 = arith.mulf %220, %221 : vector<1x128xf32>
    %cst_97 = arith.constant 9.99999974E-6 : f32
    %223 = vector.broadcast %cst_97 : f32 to vector<1x128xf32>
    %224 = arith.addf %222, %223 : vector<1x128xf32>
    %225 = math.rsqrt %224 : vector<1x128xf32>
    %226 = arith.mulf %194, %225 : vector<1x128xf32>
    %227 = vector.broadcast %226 : vector<1x128xf32> to vector<32x128xf32>
    %228 = arith.mulf %209, %227 : vector<32x128xf32>
    %229 = vector.broadcast %195 : vector<1x128xf32> to vector<32x128xf32>
    %230 = arith.addf %228, %229 : vector<32x128xf32>
    %231 = arith.addf %193, %230 : vector<32x128xf32>
    %cst_98 = arith.constant 0.000000e+00 : f32
    %232 = vector.broadcast %cst_98 : f32 to vector<32x128xf32>
    %233 = arith.maximumf %231, %232 : vector<32x128xf32>
    %c0_99 = arith.constant 0 : index
    %c0_100 = arith.constant 0 : index
    %234 = vector.load %arg5[%c0_99, %c0_100] : memref<32x128xf32, #tpu.memory_space<vmem>>, vector<32x128xf32>
    tpu.vector_store %arg5[%c0_99, %c0_100], %233 {strides = array<i32>} : memref<32x128xf32, #tpu.memory_space<vmem>>, vector<32x128xf32>,
    return
  }
}

</mosaic_0001>

<bundles_post_ra>
// kernel: tpu_custom_call.1
= control target key start
LH: loop header
LB: loop body
LE: loop exit
PB: predicated region body
PF: predicated region fallthrough
CT: control target
= control target key end

     0   :  { %10 = vsyncpa [#allocation3], 0  ;;  %s1748_s0 = inlined_call_operand.hbm [shape: f32[32,64], index: 0, kind: input, shape index: {}]   ;;  %s1749_s1 = inlined_call_operand.hbm [shape: bf16[2,64,128], index: 1, kind: input, shape index: {}]   ;;  %s1750_s2 = inlined_call_operand.hbm [shape: bf16[64,256], index: 2, kind: input, shape index: {}]   ;;  %s1751_s3 = inlined_call_operand.hbm [shape: bf16[3,128,128], index: 3, kind: input, shape index: {}]   ;;  %s1752_s4 = inlined_call_operand.hbm [shape: f32[8,128], index: 4, kind: input, shape index: {}]   ;;  %s1753_s5 = inlined_call_operand.hbm [shape: f32[32,128], index: 5, kind: output, shape index: {}]  }
   0x1   :  { %11 = vsyncpa [#allocation6], 0 }
   0x2   :  { %12 = vsyncpa [#allocation9], 0 }
   0x3   :  { %13 = vsyncpa [#allocation4], 0  ;;  %s1496_s18 = smov [#allocation5]  }
   0x4   :  { %s31_s19 = sshll.u32 %s1496_s18, 4  ;;  %s32_s19 = int_to_ptr.vmem [resolvable:$true] %s31_s19 }
   0x5   :  { %s1376_s20 = scalar_lea.vmem %s32_s19, 1024  ;;  %p1381_p1 = scmp.lt.s32.totalorder %s32_s19, %s32_s19 }
   0x6   :  { %p1377_p0 = scmp.ne.s32.totalorder %s32_s19, %s1376_s20  ;;  %p1382_p2 = scmp.lt.s32.totalorder %s1376_s20, %s1376_s20 }
   0x8   :  { %p1383_p3 = por %p1382_p2, %p1381_p1 }
   0xa   :  { %p1384_p4 = pnand %p1383_p3, %p1377_p0 }
   0xc   :  { %1387 = shalt.err (!%p1384_p4)
}
   0xd   :  { %s1497_s21 = smov 64   ;;  %s1498_s22 = smov 4  }
   0xe   :  { %37 = dma.hbm_to_vmem [thread:$0]  %s1749_s1, 1024, %s32_s19, [#allocation6], %s1497_s21, %s1497_s21, %s1498_s22  }
   0xf   :  { %s1499_s25 = smov [#allocation8]   ;;  %s1500_s27 = smov [#allocation2]  }
  0x10   :  { %s55_s26 = sshll.u32 %s1499_s25, 4  ;;  %s19_s28 = sshll.u32 %s1500_s27, 4  ;;  %s56_s26 = int_to_ptr.vmem [resolvable:$true] %s55_s26  ;;  %s20_s28 = int_to_ptr.vmem [resolvable:$true] %s19_s28 }
  0x11   :  { %s1396_s29 = scalar_lea.vmem %s56_s26, 3072  ;;  %p1401_p6 = scmp.lt.s32.totalorder %s56_s26, %s56_s26 }
  0x12   :  { %p1397_p5 = scmp.ne.s32.totalorder %s56_s26, %s1396_s29  ;;  %p1402_p7 = scmp.lt.s32.totalorder %s1396_s29, %s1396_s29 }
  0x14   :  { %p1403_p8 = por %p1402_p7, %p1401_p6 }
  0x16   :  { %p1404_p9 = pnand %p1403_p8, %p1397_p5 }
  0x18   :  { %1407 = shalt.err (!%p1404_p9)
}
  0x19   :  { %61 = dma.hbm_to_vmem [thread:$0]  %s1751_s3, 3072, %s56_s26, [#allocation9], %s1497_s21, %s1497_s21, %s1498_s22  }
  0x1a   :  { %s1416_s1 = scalar_lea.vmem %s20_s28, 512  ;;  %p1421_p11 = scmp.lt.s32.totalorder %s20_s28, %s20_s28 }
  0x1b   :  { %p1417_p10 = scmp.ne.s32.totalorder %s20_s28, %s1416_s1  ;;  %p1422_p12 = scmp.lt.s32.totalorder %s1416_s1, %s1416_s1 }
  0x1d   :  { %p1423_p13 = por %p1422_p12, %p1421_p11 }
  0x1f   :  { %p1424_p0 = pnand %p1423_p13, %p1417_p10 }
  0x21   :  { %1427 = shalt.err (!%p1424_p0)
}
  0x22   :  { %s1501_s7 = smov 128   ;;  %s1502_s8 = smov 8  }
  0x23   :  { %25 = dma.hbm_to_vmem [thread:$0]  %s1748_s0, 512, %s20_s28, [#allocation3], %s1501_s7, %s1501_s7, %s1502_s8  }
  0x24   :  { %s1503_s11 = smov [#allocation7]   ;;  %s1504_s3 = smov [#allocation10]  }
  0x25   :  { %s43_s12 = sshll.u32 %s1503_s11, 4  ;;  %s68_s13 = sshll.u32 %s1504_s3, 4  ;;  %s44_s12 = int_to_ptr.vmem [resolvable:$true] %s43_s12  ;;  %s69_s13 = int_to_ptr.vmem [resolvable:$true] %s68_s13 }
  0x26   :  { %s1436_s14 = scalar_lea.vmem %s44_s12, 1024  ;;  %p1441_p2 = scmp.lt.s32.totalorder %s44_s12, %s44_s12 }
  0x27   :  { %p1437_p1 = scmp.ne.s32.totalorder %s44_s12, %s1436_s14  ;;  %p1442_p3 = scmp.lt.s32.totalorder %s1436_s14, %s1436_s14 }
  0x29   :  { %p1443_p4 = por %p1442_p3, %p1441_p2 }
  0x2b   :  { %p1444_p5 = pnand %p1443_p4, %p1437_p1 }
  0x2d   :  { %1447 = shalt.err (!%p1444_p5)
}
  0x2e   :  { %49 = dma.hbm_to_vmem [thread:$0]  %s1750_s2, 1024, %s44_s12, [#allocation6], %s1501_s7, %s1501_s7, %s1502_s8  }
  0x2f   :  { %s1456_s0 = scalar_lea.vmem %s69_s13, 128  ;;  %p1461_p7 = scmp.lt.s32.totalorder %s69_s13, %s69_s13 }
  0x30   :  { %p1457_p6 = scmp.ne.s32.totalorder %s69_s13, %s1456_s0  ;;  %p1462_p8 = scmp.lt.s32.totalorder %s1456_s0, %s1456_s0 }
  0x32   :  { %p1463_p9 = por %p1462_p8, %p1461_p7 }
  0x34   :  { %p1464_p10 = pnand %p1463_p9, %p1457_p6 }
  0x36   :  { %1467 = shalt.err (!%p1464_p10)
}
  0x37   :  { %71 = dma.hbm_to_vmem [thread:$0]  %s1752_s4, 128, %s69_s13, [#allocation9]  }
  0x38   :  { %1488 = dma.done.wait [#allocation3], 512  }
  0x39   :  { %1489 = vsyncadd [#allocation3], 4294966784 }
  0x3a   :  { %1490 = dma.done.wait [#allocation6], 2048  }
  0x3b   :  { %1491 = vsyncadd [#allocation6], 4294965248 }
  0x3c   :  { %1492 = dma.done.wait [#allocation9], 3200  }
  0x3d   :  { %1493 = vsyncadd [#allocation9], 4294964096  ;;  %v202_v0 = vlaneseq  ;;  %v1505_v1 = vmov 0   ;;  %v1318_v3 = vld [vmem:[#allocation7 + $0x34] ss:$8 sps:$4 sm:$0xff]   ;;  %v1328_v16 = vld [vmem:[#allocation5 + $0x8] sm:$0xff]  }
  0x3e   :  { %181 = vmatprep.mubr.bf16.mxu0 %v1505_v1  ;;  %v1320_v5 = vld [vmem:[#allocation5 + $0x18] sm:$0xff]   ;;  %157 = vmatprep.subr.bf16.mxu0 %v1318_v3  ;;  %v1322_v9 = vld [vmem:[#allocation7 + $0x24] ss:$8 sps:$4 sm:$0xff]   ;;  %v1324_v10 = vld [vmem:[#allocation5 + $0x10] sm:$0xff]   ;;  %vm142_vm6 = vcmask 523264   ;;  %s1506_s2 = smov 16  }
  0x3f   :  { %v1566_v2 = vshrl.u32 %v202_v0, 7  ;;  %v1321_v7 = vld [vmem:[#allocation7 + $0x30] ss:$8 sps:$4 sm:$0xff]   ;;  %1220 = vmatprep.subr.bf16.mxu1 %v1320_v5  ;;  %v1325_v11 = vld [vmem:[#allocation7 + $0x20] ss:$8 sps:$4 sm:$0xff]   ;;  %s1507_s4 = smov 32  }
  0x40   :  { %158 = vmatpush1.bf16.msra.mxu0 %v1321_v7  ;;  %1221 = vmatpush3.bf16.msra.mxu1 %v1320_v5  ;;  %v1326_v14 = vld [vmem:[#allocation7 + $0x14] ss:$8 sps:$4 sm:$0xff]   ;;  %v1329_v18 = vld [vmem:[#allocation7 + $0x10] ss:$8 sps:$4 sm:$0xff]   ;;  %v1330_v19 = vld [vmem:[#allocation7 + $0x4] ss:$8 sps:$4 sm:$0xff]  }
  0x41   :  { %v206_v4 = vadd.s32 24, %v1566_v2  ;;  %v205_v6 = vadd.s32 16, %v1566_v2  ;;  %v204_v8 = vadd.s32 8, %v1566_v2  ;;  %v211_v12 = vand.u32 15, %v1566_v2  ;;  %159 = vmatprep.subr.bf16.mxu0 %v1322_v9  ;;  %1222 = vmatprep.subr.bf16.mxu1 %v1324_v10  ;;  %v1332_v20 = vld [vmem:[#allocation5] sm:$0xff]   ;;  %v89_v22 = vld [vmem:[#allocation2 + $0x8] sm:$0xff] }
  0x42   :  { %vm259_vm0 = vcmp.lt.s32.totalorder %v1566_v2, 1  ;;  %vm278_vm1 = vcmp.lt.s32.totalorder %v1566_v2, 7  ;;  %v88_v21 = vld [vmem:[#allocation2] sm:$0xff]  ;;  %v91_v27 = vld [vmem:[#allocation2 + $0x18] sm:$0xff]  ;;  %v256_v29 = vrot.slane %v89_v22, 7  ;;  %v90_v31 = vld [vmem:[#allocation2 + $0x10] sm:$0xff] }
  0x43   :  { %v232_v13 = vand.u32 15, %v206_v4  ;;  %v225_v15 = vand.u32 15, %v205_v6  ;;  %v218_v17 = vand.u32 15, %v204_v8  ;;  %vm1574_vm2 = vcmp.ne.s32.totalorder %v211_v12, 0  ;;  %v1333_v26 = vld [vmem:[#allocation7] ss:$8 sps:$4 sm:$0xff]  }
  0x44   :  { %160 = vmatpush1.bf16.msra.mxu0 %v1325_v11  ;;  %1223 = vmatpush3.bf16.msra.mxu1 %v1324_v10  ;;  %v255_v28 = vrot.slane %v88_v21, 7  ;;  %v274_v30 = vrot.slane %v88_v21, 1  ;;  %v258_v33 = vrot.slane %v91_v27, 7  ;;  %v275_v34 = vrot.slane %v89_v22, 1  ;;  %v1334_v41 = vld [vmem:[#allocation5 + $0x38] sm:$0xff]   ;;  %v1335_v48 = vld [vmem:[#allocation5 + $0x30] sm:$0xff]  }
  0x45   :  { %161 = vmatprep.subr.bf16.mxu0 %v1326_v14  ;;  %1224 = vmatprep.subr.bf16.mxu1 %v1328_v16  ;;  %vm1578_vm3 = vcmp.ne.s32.totalorder %v232_v13, 15  ;;  %vm1582_vm4 = vcmp.ne.s32.totalorder %v225_v15, 0  ;;  %vm1586_vm5 = vcmp.ne.s32.totalorder %v218_v17, 15  ;;  %v277_v35 = vrot.slane %v91_v27, 1  ;;  %v1336_v53 = vld [vmem:[#allocation5 + $0x28] sm:$0xff]   ;;  %v1337_v56 = vld [vmem:[#allocation5 + $0x20] sm:$0xff]  }
  0x46   :  { %v257_v36 = vrot.slane %v90_v31, 7  ;;  %v262_v37 = vsel %vm259_vm0, %v255_v28, %v256_v29  ;;  %v263_v38 = vsel %vm259_vm0, %v258_v33, %v255_v28  ;;  %v276_v42 = vrot.slane %v90_v31, 1  ;;  %v1356_v25 = vld [vmem:[#allocation8 + $0xa8] sm:$0xff]   ;;  %s1509_s19 = smov [#allocation11]  }
  0x47   :  { %v282_v39 = vsel %vm278_vm1, %v277_v35, %v274_v30  ;;  %v268_v43 = vsel %vm1574_vm2, %v263_v38, 0.0  ;;  %v92_v46 = vpack.c.bf16 %v89_v22, %v88_v21  ;;  %v281_v54 = vsel %vm278_vm1, %v274_v30, %v275_v34  ;;  %v1360_v32 = vld [vmem:[#allocation8 + $0x88] sm:$0xff]   ;;  %s1103_s20 = sshll.u32 %s1509_s19, 4  ;;  %s1104_s20 = int_to_ptr.vmem [resolvable:$true] %s1103_s20 }
  0x48   :  { %162 = vmatpush1.bf16.msra.mxu0 %v1329_v18  ;;  %1225 = vmatpush3.bf16.msra.mxu1 %v1328_v16  ;;  %v260_v40 = vsel %vm259_vm0, %v257_v36, %v258_v33  ;;  %v261_v44 = vsel %vm259_vm0, %v256_v29, %v257_v36  ;;  %v272_v45 = vpack.c.bf16 %v262_v37, %v268_v43  ;;  %v290_v50 = vsel %vm1578_vm3, %v282_v39, 0.0  ;;  %p1473_p12 = scmp.lt.s32.totalorder %s1104_s20, %s1104_s20 }
  0x49   :  { %163 = vmatprep.subr.bf16.mxu0 %v1330_v19  ;;  %1226 = vmatprep.subr.bf16.mxu1 %v1332_v20  ;;  %v270_v47 = vsel %vm1582_vm4, %v261_v44, 0.0  ;;  %v280_v49 = vsel %vm278_vm1, %v275_v34, %v276_v42  ;;  %v93_v55 = vpack.c.bf16 %v91_v27, %v90_v31  ;;  %v279_v58 = vsel %vm278_vm1, %v276_v42, %v277_v35 }
  0x4a   :  { %v273_v51 = vpack.c.bf16 %v260_v40, %v270_v47  ;;  %v288_v52 = vsel %vm1586_vm5, %v280_v49, 0.0  ;;  %1228 = vmatprep.mubr.msk.bf16.mxu1 %vm142_vm6, %v272_v45  ;;  %v292_v59 = vpack.c.bf16 %v290_v50, %v279_v58  ;;  %vm1508_vm7 = vmmov 1  }
  0x4b   :  { %v291_v57 = vpack.c.bf16 %v288_v52, %v281_v54  ;;  %vm1148_vm8 = vmpackc.low %vm1508_vm7, %vm1574_vm2 }
  0x4c   :  { %164 = vmatpush1.bf16.msra.mxu0 %v1333_v26  ;;  %1227 = vmatpush3.bf16.msra.mxu1 %v1332_v20  ;;  %vm1151_vm9 = vmpackc.low %vm1508_vm7, %vm1582_vm4 }
  0x4d   :  { %1232 = vmatprep.subr.bf16.mxu0 %v1334_v41  ;;  %vm1170_vm10 = vmpackc.low %vm1586_vm5, %vm1508_vm7 }
  0x4e   :  { %vm1173_vm11 = vmpackc.low %vm1578_vm3, %vm1508_vm7 }
  0x4f   :  { %1125 = vmatmul.mubr.msk.bf16.vlgmr.msra.gmra.mxu0 %vm142_vm6, %v92_v46  ;;  %1229 = vmatmul.mubr.msk.bf16.vlgmr.msra.gmra.mxu1 %vm142_vm6, %v273_v51 }
  0x50   :  { %1233 = vmatpush3.bf16.msra.mxu0 %v1334_v41  ;;  %191 = vmatprep.mubr.bf16.mxu0 %v1505_v1  ;;  %v1634_v41 = vsub.s32 0, %v1566_v2 }
  0x51   :  { %1234 = vmatprep.subr.bf16.mxu0 %v1335_v48 }
  0x54   :  { %1235 = vmatpush3.bf16.msra.mxu0 %v1335_v48 }
  0x55   :  { %1236 = vmatprep.subr.bf16.mxu0 %v1336_v53 }
  0x57   :  { %1126 = vmatmul.mubr.msk.bf16.gmra.mxu0 %vm142_vm6, %v93_v55 }
  0x58   :  { %1237 = vmatpush3.bf16.msra.mxu0 %v1336_v53  ;;  %1240 = vmatprep.mubr.msk.bf16.mxu0 %vm142_vm6, %v291_v57 }
  0x59   :  { %1238 = vmatprep.subr.bf16.mxu0 %v1337_v56 }
  0x5c   :  { %1239 = vmatpush3.bf16.msra.mxu0 %v1337_v56 }
  0x5f   :  { %1241 = vmatmul.mubr.msk.bf16.vlgmr.msra.gmra.mxu0 %vm142_vm6, %v292_v59 }
 0x10f   :  { %v183_v60 = vpop.f32.mrf.mxu0  ;;  %v1230_v63 = vpop.f32.mrf.mxu1 }
 0x111   :  { %v1621_v61 = vpop.f32.mrf.mxu0  ;;  %v365_v3 = vpop.f32.mrf.mxu1 }
 0x112   :  { %v380_v12 = vadd.f32 %v365_v3, %v183_v60 }
 0x113   :  { %v187_v62 = vpop.f32.mrf.mxu0  ;;  %v1231_v6 = vpop.f32.mrf.mxu1 }
 0x115   :  { %v1623_v0 = vpop.f32.mrf.mxu0  ;;  %v368_v9 = vpop.f32.mrf.mxu1 }
 0x116   :  { %v381_v13 = vadd.f32 %v368_v9, %v187_v62 }
 0x117   :  { %v193_v1 = vpop.f32.mrf.mxu0 }
 0x118   :  { %v382_v15 = vadd.f32 %v1230_v63, %v193_v1 }
 0x119   :  { %v1625_v4 = vpop.f32.mrf.mxu0 }
 0x11b   :  { %v197_v5 = vpop.f32.mrf.mxu0 }
 0x11c   :  { %v383_v18 = vadd.f32 %v1231_v6, %v197_v5  ;;  %v1011_v6 = vadd.f32 %v1623_v0, %v1621_v61 }
 0x11d   :  { %v1627_v7 = vpop.f32.mrf.mxu0 }
 0x11f   :  { %v1242_v8 = vpop.f32.mrf.mxu0 }
 0x120   :  { %v474_v19 = vadd.f32 %v1242_v8, %v382_v15  ;;  %v1012_v8 = vadd.f32 %v1011_v6, %v1625_v4  ;;  %v1340_v15 = vld [vmem:[#allocation8 + $0x70] sm:$0xff]  }
 0x121   :  { %v457_v10 = vpop.f32.mrf.mxu0 }
 0x122   :  { %v472_v16 = vadd.f32 %v457_v10, %v380_v12  ;;  %v1013_v9 = vadd.f32 %v1012_v8, %v1627_v7  ;;  %v1338_v12 = vld [vmem:[#allocation8 + $0x78] sm:$0xff]  }
 0x123   :  { %v1243_v11 = vpop.f32.mrf.mxu0  ;;  %1264 = vmatprep.subr.bf16.mxu0 %v1338_v12 }
 0x124   :  { %v475_v21 = vadd.f32 %v1243_v11, %v383_v18  ;;  %v1014_v10 = vrot.slane %v1013_v9, 4  ;;  %1265 = vmatpush3.bf16.msra.mxu0 %v1338_v12  ;;  %v1342_v18 = vld [vmem:[#allocation8 + $0x68] sm:$0xff]  }
 0x125   :  { %v460_v14 = vpop.f32.mrf.mxu0  ;;  %1266 = vmatprep.subr.bf16.mxu0 %v1340_v15 }
 0x126   :  { %v473_v17 = vadd.f32 %v460_v14, %v381_v13  ;;  %v1015_v11 = vadd.f32 %v1014_v10, %v1013_v9  ;;  %v1339_v13 = vld [vmem:[#allocation8 + $0x38] sm:$0xff]  }
 0x127   :  { %1244 = vmatprep.subr.bf16.mxu1 %v1339_v13 }
 0x128   :  { %v478_v20 = vadd.f32 %v473_v17, %v472_v16  ;;  %v1016_v14 = vrot.slane %v1015_v11, 2  ;;  %1245 = vmatpush3.bf16.msra.mxu1 %v1339_v13  ;;  %1267 = vmatpush3.bf16.msra.mxu0 %v1340_v15 }
 0x129   :  { %1268 = vmatprep.subr.bf16.mxu0 %v1342_v18 }
 0x12a   :  { %v479_v22 = vadd.f32 %v478_v20, %v474_v19 }
 0x12c   :  { %v480_v26 = vadd.f32 %v479_v22, %v475_v21  ;;  %1269 = vmatpush3.bf16.msra.mxu0 %v1342_v18 }
 0x12e   :  { %v481_v27 = vrot.slane %v480_v26, 4 }
 0x130   :  { %v482_v28 = vadd.f32 %v481_v27, %v480_v26  ;;  %v1344_v26 = vld [vmem:[#allocation8 + $0x60] sm:$0xff]  }
 0x131   :  { %1270 = vmatprep.subr.bf16.mxu0 %v1344_v26  ;;  %v1345_v27 = vld [vmem:[#allocation8 + $0x20] sm:$0xff]  }
 0x132   :  { %v483_v29 = vrot.slane %v482_v28, 2  ;;  %1271 = vmatpush3.bf16.msra.mxu0 %v1344_v26  ;;  %v1358_v26 = vld [vmem:[#allocation8 + $0x98] sm:$0xff]  }
 0x134   :  { %v484_v30 = vadd.f32 %v483_v29, %v482_v28  ;;  %v1346_v29 = vld [vmem:[#allocation8 + $0x58] sm:$0xff]  }
 0x135   :  { %1272 = vmatprep.subr.bf16.mxu0 %v1346_v29 }
 0x136   :  { %v485_v31 = vrot.slane %v484_v30, 1  ;;  %1273 = vmatpush3.bf16.msra.mxu0 %v1346_v29 }
 0x138   :  { %v486_v33 = vadd.f32 %v485_v31, %v484_v30  ;;  %v1347_v30 = vld [vmem:[#allocation8 + $0x18] sm:$0xff]   ;;  %v1348_v31 = vld [vmem:[#allocation8 + $0x50] sm:$0xff]  }
 0x139   :  { %1274 = vmatprep.subr.bf16.mxu0 %v1348_v31 }
 0x13a   :  { %487 = vrot.lane.b32.xlu0 %v486_v33, %s1502_s8  ;;  %1275 = vmatpush3.bf16.msra.mxu0 %v1348_v31 }
 0x1ac   :  { %v488_v34 = vpop.permute.xlu0 %487 }
 0x1ad   :  { %v489_v35 = vadd.f32 %v488_v34, %v486_v33  ;;  %v1349_v33 = vld [vmem:[#allocation8 + $0x10] sm:$0xff]   ;;  %v1350_v34 = vld [vmem:[#allocation8 + $0x48] sm:$0xff]  }
 0x1ae   :  { %1276 = vmatprep.subr.bf16.mxu0 %v1350_v34 }
 0x1af   :  { %490 = vrot.lane.b32.xlu0 %v489_v35, %s1506_s2  ;;  %1277 = vmatpush3.bf16.msra.mxu0 %v1350_v34 }
 0x221   :  { %v491_v36 = vpop.permute.xlu0 %490 }
 0x222   :  { %v492_v37 = vadd.f32 %v491_v36, %v489_v35  ;;  %v1351_v35 = vld [vmem:[#allocation8 + $0x8] sm:$0xff]   ;;  %v1352_v36 = vld [vmem:[#allocation8 + $0x40] sm:$0xff]  }
 0x223   :  { %1278 = vmatprep.subr.bf16.mxu0 %v1352_v36 }
 0x224   :  { %493 = vrot.lane.b32.xlu1 %v492_v37, %s1507_s4  ;;  %1279 = vmatpush3.bf16.msra.mxu0 %v1352_v36 }
 0x296   :  { %v494_v38 = vpop.permute.xlu1 %493 }
 0x297   :  { %v495_v39 = vadd.f32 %v494_v38, %v492_v37  ;;  %v1353_v37 = vld [vmem:[#allocation8] sm:$0xff]   ;;  %v1354_v38 = vld [vmem:[#allocation8 + $0xb8] sm:$0xff]  }
 0x299   :  { %496 = vrot.lane.b32.xlu1 %v495_v39, %s1497_s21 }
 0x30b   :  { %v497_v40 = vpop.permute.xlu1 %496 }
 0x30c   :  { %v498_v42 = vadd.f32 %v497_v40, %v495_v39 }
 0x30e   :  { %v499_v43 = vmul.f32 0.001953125, %v498_v42 }
 0x310   :  { %v503_v44 = vrot.slane %v499_v43, %v1634_v41 }
 0x312   :  { %v1637_v45 = vsub.f32 %v472_v16, %v503_v44  ;;  %v1639_v46 = vsub.f32 %v473_v17, %v503_v44  ;;  %v1641_v47 = vsub.f32 %v474_v19, %v503_v44  ;;  %v1643_v48 = vsub.f32 %v475_v21, %v503_v44  ;;  %v1341_v16 = vld [vmem:[#allocation8 + $0x30] sm:$0xff]   ;;  %v1343_v19 = vld [vmem:[#allocation8 + $0x28] sm:$0xff]  }
 0x313   :  { %v1017_v17 = vadd.f32 %v1016_v14, %v1015_v11  ;;  %1246 = vmatprep.subr.bf16.mxu1 %v1341_v16 }
 0x314   :  { %v508_v49 = vmul.f32 %v1637_v45, %v1637_v45  ;;  %v509_v50 = vmul.f32 %v1639_v46, %v1639_v46  ;;  %v510_v51 = vmul.f32 %v1641_v47, %v1641_v47  ;;  %v511_v53 = vmul.f32 %v1643_v48, %v1643_v48  ;;  %1247 = vmatpush3.bf16.msra.mxu1 %v1341_v16 }
 0x315   :  { %v1018_v22 = vrot.slane %v1017_v17, 1  ;;  %1248 = vmatprep.subr.bf16.mxu1 %v1343_v19 }
 0x316   :  { %v512_v52 = vadd.f32 %v509_v50, %v508_v49  ;;  %v476_v50 = vld [vmem:[#allocation10] sm:$0x1] }
 0x317   :  { %v1019_v28 = vadd.f32 %v1018_v22, %v1017_v17  ;;  %v1357_v22 = vld [vmem:[#allocation8 + $0xa0] sm:$0xff]  }
 0x318   :  { %v513_v54 = vadd.f32 %v512_v52, %v510_v51  ;;  %1249 = vmatpush3.bf16.msra.mxu1 %v1343_v19 }
 0x319   :  { %1250 = vmatprep.subr.bf16.mxu1 %v1345_v27 }
 0x31a   :  { %v514_v55 = vadd.f32 %v513_v54, %v511_v53  ;;  %v1139_v54 = vld [vmem:[#allocation10 + $0x1] ss:$0 sm:$0xff] }
 0x31c   :  { %v515_v56 = vrot.slane %v514_v55, 4  ;;  %1251 = vmatpush3.bf16.msra.mxu1 %v1345_v27  ;;  %v1359_v27 = vld [vmem:[#allocation8 + $0x90] sm:$0xff]  }
 0x31d   :  { %1252 = vmatprep.subr.bf16.mxu1 %v1347_v30 }
 0x31e   :  { %v516_v57 = vadd.f32 %v515_v56, %v514_v55 }
 0x320   :  { %v517_v58 = vrot.slane %v516_v57, 2  ;;  %1253 = vmatpush3.bf16.msra.mxu1 %v1347_v30 }
 0x321   :  { %1254 = vmatprep.subr.bf16.mxu1 %v1349_v33 }
 0x322   :  { %v518_v59 = vadd.f32 %v517_v58, %v516_v57 }
 0x324   :  { %v519_v60 = vrot.slane %v518_v59, 1  ;;  %1255 = vmatpush3.bf16.msra.mxu1 %v1349_v33 }
 0x325   :  { %1256 = vmatprep.subr.bf16.mxu1 %v1351_v35 }
 0x326   :  { %v520_v62 = vadd.f32 %v519_v60, %v518_v59 }
 0x328   :  { %521 = vrot.lane.b32.xlu0 %v520_v62, %s1502_s8  ;;  %1257 = vmatpush3.bf16.msra.mxu1 %v1351_v35 }
 0x329   :  { %1258 = vmatprep.subr.bf16.mxu1 %v1353_v37 }
 0x32c   :  { %1259 = vmatpush3.bf16.msra.mxu1 %v1353_v37 }
 0x32d   :  { %1284 = vmatprep.subr.bf16.mxu1 %v1354_v38 }
 0x39a   :  { %v522_v63 = vpop.permute.xlu0 %521 }
 0x39b   :  { %v523_v1 = vadd.f32 %v522_v63, %v520_v62 }
 0x39d   :  { %524 = vrot.lane.b32.xlu1 %v523_v1, %s1506_s2 }
 0x40f   :  { %v525_v3 = vpop.permute.xlu1 %524 }
 0x410   :  { %v526_v5 = vadd.f32 %v525_v3, %v523_v1 }
 0x412   :  { %527 = vrot.lane.b32.xlu0 %v526_v5, %s1507_s4 }
 0x484   :  { %v528_v20 = vpop.permute.xlu0 %527 }
 0x485   :  { %v529_v21 = vadd.f32 %v528_v20, %v526_v5  ;;  %v1355_v20 = vld [vmem:[#allocation8 + $0xb0] sm:$0xff]  }
 0x487   :  { %530 = vrot.lane.b32.xlu1 %v529_v21, %s1497_s21 }
 0x48b   :  { %1020 = vrot.lane.b32.xlu1 %v1019_v28, %s1502_s8 }
 0x4f9   :  { %v531_v39 = vpop.permute.xlu1 %530 }
 0x4fa   :  { %v532_v40 = vadd.f32 %v531_v39, %v529_v21 }
 0x4fc   :  { %v533_v42 = vmul.f32 0.001953125, %v532_v40 }
 0x4fd   :  { %v1021_v43 = vpop.permute.xlu1 %1020 }
 0x4fe   :  { %v534_v44 = vadd.f32 1e-05, %v533_v42  ;;  %v1662_v49 = vadd.f32 %v1021_v43, %v1019_v28  ;;  %v1361_v28 = vld [vmem:[#allocation8 + $0x80] sm:$0xff]  }
 0x500   :  { %1362 = vrsqrt.f32 %v534_v44  ;;  %1023 = vrot.lane.b32.xlu1 %v1662_v49, %s1506_s2 }
 0x50d   :  { %v1363_v51 = vpop.eup %1362 }
 0x50e   :  { %v536_v52 = vmul.f32 %v1363_v51, %v476_v50 }
 0x510   :  { %v540_v53 = vrot.slane %v536_v52, %v1634_v41 }
 0x512   :  { %v541_v55 = vmul.f32 %v540_v53, %v1637_v45  ;;  %v542_v56 = vmul.f32 %v540_v53, %v1639_v46  ;;  %v543_v57 = vmul.f32 %v540_v53, %v1641_v47  ;;  %v544_v58 = vmul.f32 %v540_v53, %v1643_v48 }
 0x514   :  { %v549_v59 = vadd.f32 %v1139_v54, %v541_v55  ;;  %v550_v60 = vadd.f32 %v1139_v54, %v542_v56  ;;  %v551_v62 = vadd.f32 %v1139_v54, %v543_v57  ;;  %v552_v63 = vadd.f32 %v1139_v54, %v544_v58 }
 0x516   :  { %v553_v1 = vmax.f32 %v549_v59, 0.0  ;;  %v554_v3 = vmax.f32 %v550_v60, 0.0  ;;  %v555_v5 = vmax.f32 %v551_v62, 0.0  ;;  %v556_v6 = vmax.f32 %v552_v63, 0.0 }
 0x518   :  { %v557_v8 = vpack.c.bf16 %v554_v3, %v553_v1  ;;  %v558_v9 = vpack.c.bf16 %v556_v6, %v555_v5  ;;  %v578_v10 = vrot.slane %v555_v5, 7  ;;  %v576_v11 = vrot.slane %v553_v1, 7 }
 0x519   :  { %v577_v12 = vrot.slane %v554_v3, 7  ;;  %v579_v45 = vrot.slane %v556_v6, 7  ;;  %v590_v13 = vrot.slane %v553_v1, 1  ;;  %v591_v46 = vrot.slane %v554_v3, 1 }
 0x51a   :  { %1280 = vmatprep.mubr.bf16.mxu0 %v557_v8  ;;  %v592_v47 = vrot.slane %v555_v5, 1  ;;  %v593_v29 = vrot.slane %v556_v6, 1 }
 0x51b   :  { %1281 = vmatmul.mubr.bf16.vlgmr.msra.gmra.mxu0 %v558_v9  ;;  %v582_v48 = vsel %vm259_vm0, %v576_v11, %v577_v12  ;;  %v583_v14 = vsel %vm259_vm0, %v579_v45, %v576_v11  ;;  %v580_v15 = vsel %vm259_vm0, %v578_v10, %v579_v45  ;;  %v581_v16 = vsel %vm259_vm0, %v577_v12, %v578_v10 }
 0x51c   :  { %v1149_v17 = vpack.c.bf16 %v582_v48, %v583_v14  ;;  %v1152_v18 = vpack.c.bf16 %v580_v15, %v581_v16  ;;  %v595_v19 = vsel %vm278_vm1, %v591_v46, %v592_v47  ;;  %v596_v23 = vsel %vm278_vm1, %v590_v13, %v591_v46 }
 0x51d   :  { %v1171_v21 = vpack.c.bf16 %v595_v19, %v596_v23  ;;  %v594_v30 = vsel %vm278_vm1, %v592_v47, %v593_v29  ;;  %v597_v31 = vsel %vm278_vm1, %v593_v29, %v590_v13 }
 0x51e   :  { %1260 = vmatprep.mubr.msk.bf16.mxu1 %vm1148_vm8, %v1149_v17  ;;  %v1174_v33 = vpack.c.bf16 %v597_v31, %v594_v30 }
 0x51f   :  { %1261 = vmatmul.mubr.msk.bf16.vlgmr.msra.gmra.mxu1 %vm1151_vm9, %v1152_v18 }
 0x520   :  { %1285 = vmatpush3.bf16.msra.mxu1 %v1354_v38  ;;  %1300 = vmatprep.mubr.msk.bf16.mxu1 %vm1170_vm10, %v1171_v21 }
 0x521   :  { %1286 = vmatprep.subr.bf16.mxu1 %v1355_v20 }
 0x524   :  { %1287 = vmatpush3.bf16.msra.mxu1 %v1355_v20 }
 0x525   :  { %1288 = vmatprep.subr.bf16.mxu1 %v1356_v25 }
 0x528   :  { %1289 = vmatpush3.bf16.msra.mxu1 %v1356_v25 }
 0x529   :  { %1290 = vmatprep.subr.bf16.mxu1 %v1357_v22 }
 0x52c   :  { %1291 = vmatpush3.bf16.msra.mxu1 %v1357_v22 }
 0x52d   :  { %1292 = vmatprep.subr.bf16.mxu1 %v1358_v26 }
 0x530   :  { %1293 = vmatpush3.bf16.msra.mxu1 %v1358_v26 }
 0x531   :  { %1294 = vmatprep.subr.bf16.mxu1 %v1359_v27 }
 0x534   :  { %1295 = vmatpush3.bf16.msra.mxu1 %v1359_v27 }
 0x535   :  { %1296 = vmatprep.subr.bf16.mxu1 %v1360_v32 }
 0x538   :  { %1297 = vmatpush3.bf16.msra.mxu1 %v1360_v32 }
 0x539   :  { %1298 = vmatprep.subr.bf16.mxu1 %v1361_v28 }
 0x53c   :  { %1299 = vmatpush3.bf16.msra.mxu1 %v1361_v28 }
 0x53f   :  { %1301 = vmatmul.mubr.msk.bf16.vlgmr.msra.gmra.mxu1 %vm1173_vm11, %v1174_v33 }
 0x572   :  { %v1024_v34 = vpop.permute.xlu1 %1023 }
 0x573   :  { %v1025_v35 = vadd.f32 %v1024_v34, %v1662_v49 }
 0x575   :  { %1026 = vrot.lane.b32.xlu1 %v1025_v35, %s1507_s4 }
 0x5db   :  { %v1282_v2 = vpop.f32.mrf.mxu0 }
 0x5dd   :  { %v799_v42 = vpop.f32.mrf.mxu0 }
 0x5df   :  { %v1262_v38 = vpop.f32.mrf.mxu1  ;;  %v1283_v44 = vpop.f32.mrf.mxu0 }
 0x5e0   :  { %v808_v55 = vadd.f32 %v1282_v2, %v1262_v38 }
 0x5e1   :  { %v702_v39 = vpop.f32.mrf.mxu1  ;;  %v802_v51 = vpop.f32.mrf.mxu0 }
 0x5e2   :  { %v800_v53 = vadd.f32 %v799_v42, %v702_v39 }
 0x5e3   :  { %v1263_v40 = vpop.f32.mrf.mxu1 }
 0x5e4   :  { %v811_v58 = vadd.f32 %v1283_v44, %v1263_v40 }
 0x5e5   :  { %v705_v43 = vpop.f32.mrf.mxu1 }
 0x5e6   :  { %v803_v54 = vadd.f32 %v802_v51, %v705_v43 }
 0x5e7   :  { %v1027_v36 = vpop.permute.xlu1 %1026 }
 0x5e8   :  { %v1028_v37 = vadd.f32 %v1027_v36, %v1025_v35 }
 0x5ea   :  { %1029 = vrot.lane.b32.xlu1 %v1028_v37, %s1497_s21 }
 0x5ff   :  { %v1302_v24 = vpop.f32.mrf.mxu1 }
 0x600   :  { %v930_v59 = vadd.f32 %v1302_v24, %v808_v55 }
 0x601   :  { %v913_v50 = vpop.f32.mrf.mxu1 }
 0x602   :  { %v928_v56 = vadd.f32 %v913_v50, %v800_v53 }
 0x603   :  { %v1303_v52 = vpop.f32.mrf.mxu1 }
 0x604   :  { %v931_v62 = vadd.f32 %v1303_v52, %v811_v58 }
 0x605   :  { %v916_v49 = vpop.f32.mrf.mxu1 }
 0x606   :  { %v929_v57 = vadd.f32 %v916_v49, %v803_v54 }
 0x608   :  { %v934_v60 = vadd.f32 %v929_v57, %v928_v56 }
 0x60a   :  { %v935_v63 = vadd.f32 %v934_v60, %v930_v59 }
 0x60c   :  { %v936_v1 = vadd.f32 %v935_v63, %v931_v62 }
 0x60e   :  { %v937_v3 = vrot.slane %v936_v1, 4 }
 0x610   :  { %v938_v5 = vadd.f32 %v937_v3, %v936_v1 }
 0x612   :  { %v939_v6 = vrot.slane %v938_v5, 2 }
 0x614   :  { %v940_v8 = vadd.f32 %v939_v6, %v938_v5 }
 0x616   :  { %v941_v9 = vrot.slane %v940_v8, 1 }
 0x618   :  { %v942_v10 = vadd.f32 %v941_v9, %v940_v8 }
 0x61a   :  { %943 = vrot.lane.b32.xlu0 %v942_v10, %s1502_s8 }
 0x65c   :  { %v1030_v11 = vpop.permute.xlu1 %1029 }
 0x65d   :  { %v1031_v12 = vadd.f32 %v1030_v11, %v1028_v37 }
 0x65f   :  { %v1032_v45 = vmul.f32 0.001953125, %v1031_v12 }
 0x661   :  { %v1036_v13 = vrot.slane %v1032_v45, %v1634_v41 }
 0x663   :  { %v1705_v46 = vsub.f32 %v1621_v61, %v1036_v13  ;;  %v1708_v47 = vsub.f32 %v1623_v0, %v1036_v13  ;;  %v1711_v48 = vsub.f32 %v1625_v4, %v1036_v13  ;;  %v1714_v14 = vsub.f32 %v1627_v7, %v1036_v13 }
 0x665   :  { %v1041_v15 = vmul.f32 %v1705_v46, %v1705_v46  ;;  %v1042_v16 = vmul.f32 %v1708_v47, %v1708_v47  ;;  %v1043_v17 = vmul.f32 %v1711_v48, %v1711_v48  ;;  %v1044_v0 = vmul.f32 %v1714_v14, %v1714_v14 }
 0x667   :  { %v1045_v61 = vadd.f32 %v1042_v16, %v1041_v15 }
 0x669   :  { %v1046_v18 = vadd.f32 %v1045_v61, %v1043_v17  ;;  %v1009_v17 = vld [vmem:[#allocation10 + $0x4] sm:$0x1] }
 0x66b   :  { %v1047_v19 = vadd.f32 %v1046_v18, %v1044_v0  ;;  %v932_v18 = vld [vmem:[#allocation10 + $0x2] sm:$0x1] }
 0x66d   :  { %v1048_v4 = vrot.slane %v1047_v19, 4 }
 0x66f   :  { %v1049_v23 = vadd.f32 %v1048_v4, %v1047_v19 }
 0x671   :  { %v1050_v20 = vrot.slane %v1049_v23, 2 }
 0x673   :  { %v1051_v7 = vadd.f32 %v1050_v20, %v1049_v23 }
 0x675   :  { %v1052_v21 = vrot.slane %v1051_v7, 1 }
 0x677   :  { %v1053_v25 = vadd.f32 %v1052_v21, %v1051_v7 }
 0x679   :  { %1054 = vrot.lane.b32.xlu1 %v1053_v25, %s1502_s8 }
 0x68c   :  { %v944_v22 = vpop.permute.xlu0 %943 }
 0x68d   :  { %v945_v26 = vadd.f32 %v944_v22, %v942_v10  ;;  %v1177_v22 = vld [vmem:[#allocation10 + $0x5] ss:$0 sm:$0xff] }
 0x68f   :  { %946 = vrot.lane.b32.xlu0 %v945_v26, %s1506_s2 }
 0x6eb   :  { %v1055_v27 = vpop.permute.xlu1 %1054 }
 0x6ec   :  { %v1056_v32 = vadd.f32 %v1055_v27, %v1053_v25 }
 0x6ee   :  { %1057 = vrot.lane.b32.xlu1 %v1056_v32, %s1506_s2 }
 0x701   :  { %v947_v28 = vpop.permute.xlu0 %946 }
 0x702   :  { %v948_v29 = vadd.f32 %v947_v28, %v945_v26  ;;  %v1176_v26 = vld [vmem:[#allocation10 + $0x3] ss:$0 sm:$0xff] }
 0x704   :  { %949 = vrot.lane.b32.xlu0 %v948_v29, %s1507_s4 }
 0x760   :  { %v1058_v30 = vpop.permute.xlu1 %1057 }
 0x761   :  { %v1059_v31 = vadd.f32 %v1058_v30, %v1056_v32 }
 0x763   :  { %1060 = vrot.lane.b32.xlu1 %v1059_v31, %s1507_s4 }
 0x776   :  { %v950_v33 = vpop.permute.xlu0 %949 }
 0x777   :  { %v951_v34 = vadd.f32 %v950_v33, %v948_v29 }
 0x779   :  { %952 = vrot.lane.b32.xlu0 %v951_v34, %s1497_s21 }
 0x7d5   :  { %v1061_v35 = vpop.permute.xlu1 %1060 }
 0x7d6   :  { %v1062_v36 = vadd.f32 %v1061_v35, %v1059_v31 }
 0x7d8   :  { %1063 = vrot.lane.b32.xlu1 %v1062_v36, %s1497_s21 }
 0x7eb   :  { %v953_v37 = vpop.permute.xlu0 %952 }
 0x7ec   :  { %v954_v38 = vadd.f32 %v953_v37, %v951_v34 }
 0x7ee   :  { %v955_v39 = vmul.f32 0.001953125, %v954_v38 }
 0x7f0   :  { %v959_v2 = vrot.slane %v955_v39, %v1634_v41 }
 0x7f2   :  { %v960_v40 = vsub.f32 %v928_v56, %v959_v2  ;;  %v961_v42 = vsub.f32 %v929_v57, %v959_v2  ;;  %v962_v43 = vsub.f32 %v930_v59, %v959_v2  ;;  %v963_v44 = vsub.f32 %v931_v62, %v959_v2 }
 0x7f4   :  { %v964_v24 = vmul.f32 %v960_v40, %v960_v40  ;;  %v965_v50 = vmul.f32 %v961_v42, %v961_v42  ;;  %v966_v51 = vmul.f32 %v962_v43, %v962_v43  ;;  %v967_v53 = vmul.f32 %v963_v44, %v963_v44 }
 0x7f6   :  { %v968_v52 = vadd.f32 %v965_v50, %v964_v24 }
 0x7f8   :  { %v969_v54 = vadd.f32 %v968_v52, %v966_v51 }
 0x7fa   :  { %v970_v49 = vadd.f32 %v969_v54, %v967_v53 }
 0x7fc   :  { %v971_v55 = vrot.slane %v970_v49, 4 }
 0x7fe   :  { %v972_v58 = vadd.f32 %v971_v55, %v970_v49 }
 0x800   :  { %v973_v60 = vrot.slane %v972_v58, 2 }
 0x802   :  { %v974_v63 = vadd.f32 %v973_v60, %v972_v58 }
 0x804   :  { %v975_v1 = vrot.slane %v974_v63, 1 }
 0x806   :  { %v976_v3 = vadd.f32 %v975_v1, %v974_v63 }
 0x808   :  { %977 = vrot.lane.b32.xlu0 %v976_v3, %s1502_s8 }
 0x84a   :  { %v1064_v8 = vpop.permute.xlu1 %1063 }
 0x84b   :  { %v1065_v9 = vadd.f32 %v1064_v8, %v1062_v36 }
 0x84d   :  { %v1066_v10 = vmul.f32 0.001953125, %v1065_v9 }
 0x84f   :  { %v1067_v11 = vadd.f32 1e-05, %v1066_v10 }
 0x851   :  { %1364 = vrsqrt.f32 %v1067_v11 }
 0x85e   :  { %v1365_v16 = vpop.eup %1364 }
 0x85f   :  { %v1069_v61 = vmul.f32 %v1365_v16, %v1009_v17 }
 0x861   :  { %v1073_v0 = vrot.slane %v1069_v61, %v1634_v41 }
 0x863   :  { %v1074_v23 = vmul.f32 %v1073_v0, %v1705_v46  ;;  %v1075_v20 = vmul.f32 %v1073_v0, %v1708_v47  ;;  %v1076_v7 = vmul.f32 %v1073_v0, %v1711_v48  ;;  %v1077_v21 = vmul.f32 %v1073_v0, %v1714_v14 }
 0x865   :  { %v1082_v30 = vadd.f32 %v1177_v22, %v1074_v23  ;;  %v1083_v31 = vadd.f32 %v1177_v22, %v1075_v20  ;;  %v1084_v33 = vadd.f32 %v1177_v22, %v1076_v7  ;;  %v1085_v34 = vadd.f32 %v1177_v22, %v1077_v21 }
 0x87a   :  { %v978_v5 = vpop.permute.xlu0 %977 }
 0x87b   :  { %v979_v56 = vadd.f32 %v978_v5, %v976_v3 }
 0x87d   :  { %980 = vrot.lane.b32.xlu0 %v979_v56, %s1506_s2 }
 0x8ef   :  { %v981_v57 = vpop.permute.xlu0 %980 }
 0x8f0   :  { %v982_v59 = vadd.f32 %v981_v57, %v979_v56 }
 0x8f2   :  { %983 = vrot.lane.b32.xlu0 %v982_v59, %s1507_s4 }
 0x964   :  { %v984_v62 = vpop.permute.xlu0 %983 }
 0x965   :  { %v985_v6 = vadd.f32 %v984_v62, %v982_v59 }
 0x967   :  { %986 = vrot.lane.b32.xlu0 %v985_v6, %s1497_s21  ;;  %s1468_s21 = scalar_lea.vmem %s1104_s20, 512 }
 0x968   :  { %p1469_p11 = scmp.ne.s32.totalorder %s1104_s20, %s1468_s21  ;;  %p1474_p13 = scmp.lt.s32.totalorder %s1468_s21, %s1468_s21 }
 0x96a   :  { %p1475_p0 = por %p1474_p13, %p1473_p12 }
 0x96c   :  { %p1476_p1 = pnand %p1475_p0, %p1469_p11 }
 0x9d9   :  { %v987_v12 = vpop.permute.xlu0 %986 }
 0x9da   :  { %v988_v45 = vadd.f32 %v987_v12, %v985_v6 }
 0x9dc   :  { %v989_v13 = vmul.f32 0.001953125, %v988_v45 }
 0x9de   :  { %v990_v15 = vadd.f32 1e-05, %v989_v13 }
 0x9e0   :  { %1366 = vrsqrt.f32 %v990_v15 }
 0x9ed   :  { %v1367_v19 = vpop.eup %1366 }
 0x9ee   :  { %v992_v4 = vmul.f32 %v1367_v19, %v932_v18 }
 0x9f0   :  { %v996_v25 = vrot.slane %v992_v4, %v1634_v41 }
 0x9f2   :  { %v997_v27 = vmul.f32 %v996_v25, %v960_v40  ;;  %v998_v32 = vmul.f32 %v996_v25, %v961_v42  ;;  %v999_v28 = vmul.f32 %v996_v25, %v962_v43  ;;  %v1000_v29 = vmul.f32 %v996_v25, %v963_v44 }
 0x9f4   :  { %v1005_v35 = vadd.f32 %v1176_v26, %v997_v27  ;;  %v1006_v46 = vadd.f32 %v1176_v26, %v998_v32  ;;  %v1007_v36 = vadd.f32 %v1176_v26, %v999_v28  ;;  %v1008_v47 = vadd.f32 %v1176_v26, %v1000_v29 }
 0x9f6   :  { %v1086_v48 = vadd.f32 %v1082_v30, %v1005_v35  ;;  %v1087_v14 = vadd.f32 %v1083_v31, %v1006_v46  ;;  %v1088_v37 = vadd.f32 %v1084_v33, %v1007_v36  ;;  %v1089_v41 = vadd.f32 %v1085_v34, %v1008_v47 }
 0x9f8   :  { %v1090_v38 = vmax.f32 %v1086_v48, 0.0  ;;  %v1091_v39 = vmax.f32 %v1087_v14, 0.0  ;;  %v1092_v2 = vmax.f32 %v1088_v37, 0.0  ;;  %v1093_v40 = vmax.f32 %v1089_v41, 0.0 }
 0x9fa   :  { %1094 = vst [vmem:[#allocation11] sm:$0xff] %v1090_v38  ;;  %1095 = vst [vmem:[#allocation11 + $0x8] sm:$0xff] %v1091_v39 }
 0x9fb   :  { %1096 = vst [vmem:[#allocation11 + $0x10] sm:$0xff] %v1092_v2  ;;  %1097 = vst [vmem:[#allocation11 + $0x18] sm:$0xff] %v1093_v40 }
 0x9fc   :  { %1479 = shalt.err (!%p1476_p1)
}
 0x9fd   :  { %1109 = dma.vmem_to_hbm [thread:$0]  %s1104_s20, 512, %s1753_s5, [#allocation4], %s1501_s7, %s1501_s7, %s1502_s8  }
 0x9fe   :  { %1494 = dma.done.wait [#allocation4], 512  }
 0x9ff   :  { %1495 = vsyncadd [#allocation4], 4294966784 }
 0xa00   :  { %1113 = vsyncpa [#allocation3], 1 }
 0xa01   :  { %1114 = vsyncpa [#allocation6], 1 }
 0xa02   :  { %1115 = vsyncpa [#allocation9], 1 }
 0xa03   :  { %1116 = vsyncpa [#allocation4], 1 }

</bundles_post_ra>
